<compile_context>
chip_gen: v6e
topology: v6e:2x2x1
jax: 0.10.0
libtpu: 0.0.40
codegen_flags: <defaults>
</compile_context>

<pallas_src>
import functools
from typing import NamedTuple, Optional

import jax
import jax.numpy as jnp
from jax.experimental import pallas as pl
from jax.experimental.pallas import tpu as pltpu


def _round_up(n, m):
    return ((n + m - 1) // m) * m


def _vmem_capacity_bytes():
    """Chip-aware VMEM capacity; conservative fallback if the query is unavailable."""
    try:
        cap = getattr(pltpu.get_tpu_info(), "vmem_capacity_bytes", None)
        if cap:
            return int(cap)
    except Exception:
        pass
    return 64 * 1024 * 1024  # conservative (v7x per-TensorCore)


# --------------------------------------------------------------------------------------
# Kernels
# --------------------------------------------------------------------------------------
def _cln_gelu_epilogue(proj, cond, gb_tbl, o_ref, *, eps, d_out_true, d_out_pad,
                       n_cond_pad, approx_gelu):
    """proj: (bb, d_out_pad) f32 linear output. Applies LayerNorm (no affine),
    condition-specific scale/shift gathered via a one-hot MXU matmul, then GELU."""
    inv_d = jnp.float32(1.0 / d_out_true)

    # Two-pass LayerNorm (numerically safe). Padded feature columns of `proj` are
    # exactly zero, so the mean over the padded axis equals the true-feature mean;
    # mask the padded columns out of the centered sum of squares.
    mean = jnp.sum(proj, axis=-1, keepdims=True) * inv_d
    centered = proj - mean
    if d_out_pad != d_out_true:
        col = jax.lax.broadcasted_iota(jnp.int32, proj.shape, 1)
        centered = jnp.where(col < d_out_true, centered, jnp.float32(0.0))
    var = jnp.sum(centered * centered, axis=-1, keepdims=True) * inv_d
    inv_std = jax.lax.rsqrt(var + jnp.float32(eps))
    x_norm = centered * inv_std

    # Fused gamma|beta gather: one one-hot matmul against the (n_cond_pad, 2*d_out_pad)
    # table (tables are pre-cast to f32 and pre-padded in the wrapper).
    classes = jax.lax.broadcasted_iota(jnp.int32, (cond.shape[0], n_cond_pad), 1)
    one_hot = (cond == classes).astype(jnp.float32)
    gb = jnp.dot(one_hot, gb_tbl, preferred_element_type=jnp.float32)
    gamma = gb[:, :d_out_pad]
    beta = gb[:, d_out_pad:]
    y = gamma * x_norm + beta

    if approx_gelu:
        out = jax.nn.gelu(y, approximate=True)  # tanh -> EUP slot (opt-in)
    else:
        # Exact GELU (matches nn.GELU() default); argument scaled once.
        out = 0.5 * y * (1.0 + jax.lax.erf(y * jnp.float32(0.7071067811865476)))
    o_ref[...] = out.astype(o_ref.dtype)


def _resident_kernel(x_ref, cond_ref, w_ref, b_ref, gb_ref, o_ref, *, eps, d_out_true,
                     d_out_pad, n_cond_pad, approx_gelu):
    # Linear: x @ W^T + b with native-dtype MXU operands and f32 accumulation.
    proj = jnp.dot(x_ref[...], w_ref[...], preferred_element_type=jnp.float32)
    proj = proj + b_ref[...]
    _cln_gelu_epilogue(proj, cond_ref[...], gb_ref[...], o_ref, eps=eps,
                       d_out_true=d_out_true, d_out_pad=d_out_pad,
                       n_cond_pad=n_cond_pad, approx_gelu=approx_gelu)


def _ktiled_kernel(x_ref, cond_ref, w_ref, b_ref, gb_ref, o_ref, acc_ref, *, eps,
                   d_out_true, d_out_pad, n_cond_pad, approx_gelu):
    k = pl.program_id(1)

    @pl.when(k == 0)
    def _():
        acc_ref[...] = jnp.zeros_like(acc_ref)

    acc_ref[...] += jnp.dot(x_ref[...], w_ref[...], preferred_element_type=jnp.float32)

    @pl.when(k == pl.num_programs(1) - 1)
    def _():
        proj = acc_ref[...] + b_ref[...]
        _cln_gelu_epilogue(proj, cond_ref[...], gb_ref[...], o_ref, eps=eps,
                           d_out_true=d_out_true, d_out_pad=d_out_pad,
                           n_cond_pad=n_cond_pad, approx_gelu=approx_gelu)


# --------------------------------------------------------------------------------------
# Parameter preparation (hoisted out of the hot path)
# --------------------------------------------------------------------------------------
class PreparedParams(NamedTuple):
    wt: jax.Array    # (d_in_pad, d_out_pad)  W^T, zero-padded, native dtype
    bias: jax.Array  # (1, d_out_pad)         float32
    gb: jax.Array    # (n_cond_pad, 2*d_out_pad) float32, [gamma | beta]
    d_in: int
    d_out: int
    n_cond: int
    d_in_pad: int
    d_out_pad: int
    n_cond_pad: int


def prepare_modality_params(W, b, gamma_emb, beta_emb) -> PreparedParams:
    """One-time transpose / pad / cast / fuse of the weight-side operands."""
    d_out, d_in = W.shape
    n_cond = gamma_emb.shape[0]
    d_in_pad = _round_up(d_in, 128)
    d_out_pad = _round_up(d_out, 128)
    n_cond_pad = _round_up(n_cond, 8)

    wt = jnp.zeros((d_in_pad, d_out_pad), dtype=W.dtype).at[:d_in, :d_out].set(W.T)
    bias = jnp.zeros((1, d_out_pad), jnp.float32).at[:, :d_out].set(b.astype(jnp.float32))
    gb = jnp.zeros((n_cond_pad, 2 * d_out_pad), jnp.float32)
    gb = gb.at[:n_cond, :d_out].set(gamma_emb.astype(jnp.float32))
    gb = gb.at[:n_cond, d_out_pad:d_out_pad + d_out].set(beta_emb.astype(jnp.float32))
    return PreparedParams(wt, bias, gb, d_in, d_out, n_cond,
                          d_in_pad, d_out_pad, n_cond_pad)


# --------------------------------------------------------------------------------------
# Public wrapper
# --------------------------------------------------------------------------------------
def modality_input_block(x, condition, W=None, b=None, gamma_emb=None, beta_emb=None, *,
                         params: Optional[PreparedParams] = None,
                         eps=1e-5, block_b=None, approx_gelu=False,
                         force_k_tiled=False, k_tile=None,
                         out_dtype=None, vmem_limit_bytes=None):
    """x: (B, D_in); condition: (B,) or (B, 1) int; either (W, b, gamma_emb, beta_emb)
    or a cached `params=prepare_modality_params(...)`."""
    if params is None:
        params = prepare_modality_params(W, b, gamma_emb, beta_emb)
    if condition.ndim == 2:
        condition = condition[:, 0]

    B, d_in = x.shape
    assert d_in == params.d_in, "x feature dim does not match prepared weights"
    d_in_pad, d_out_pad, n_cond_pad = params.d_in_pad, params.d_out_pad, params.n_cond_pad
    out_dtype = x.dtype if out_dtype is None else out_dtype

    # ---- chip-aware VMEM budget ----
    vmem_cap = _vmem_capacity_bytes()
    if vmem_limit_bytes is None:
        vmem_limit_bytes = int(0.75 * vmem_cap)
    vmem_limit_bytes = int(vmem_limit_bytes)

    x_bytes = jnp.dtype(x.dtype).itemsize
    w_bytes = jnp.dtype(params.wt.dtype).itemsize
    o_bytes = jnp.dtype(out_dtype).itemsize

    # ---- row-tile size: chip-aware default; >=2 grid steps when the batch allows ----
    if block_b is None:
        block_b = 512 if vmem_cap >= (96 << 20) else 256
        half_b = _round_up(B, 8) // 2
        if half_b >= 8:
            block_b = min(block_b, half_b)
    block_b = _round_up(max(8, min(int(block_b), _round_up(B, 8))), 8)

    # ---- path selection: VMEM-resident W^T vs K-tiled weight stream ----
    weight_bytes = d_in_pad * d_out_pad * w_bytes
    small_tables = d_out_pad * 4 + n_cond_pad * 2 * d_out_pad * 4

    def est_resident(bb):
        return (2 * bb * d_in_pad * x_bytes          # x tile (double-buffered)
                + 2 * bb * 4                         # condition ids
                + weight_bytes                       # resident W^T (single copy)
                + small_tables                       # bias + fused gamma|beta
                + 2 * bb * d_out_pad * o_bytes       # out tile (double-buffered)
                + 4 * bb * d_out_pad * 4)            # f32 epilogue temporaries headroom

    use_k_tiled = (force_k_tiled
                   or weight_bytes > 0.45 * vmem_limit_bytes
                   or est_resident(block_b) > vmem_limit_bytes)

    if use_k_tiled:
        if k_tile is None:
            k_tile = next(t for t in (512, 256, 128) if t <= d_in_pad and d_in_pad % t == 0)
        k_tile = int(k_tile)
        assert k_tile % 128 == 0 and d_in_pad % k_tile == 0, "k_tile must divide padded D_in"

        def est(bb):
            return (2 * bb * k_tile * x_bytes
                    + 2 * bb * 4
                    + 2 * k_tile * d_out_pad * w_bytes   # weight stream (double-buffered)
                    + bb * d_out_pad * 4                 # f32 accumulator scratch
                    + small_tables
                    + 2 * bb * d_out_pad * o_bytes
                    + 4 * bb * d_out_pad * 4)
    else:
        est = est_resident

    # Shrink the row tile until the residency estimate fits the chip's budget.
    while est(block_b) > vmem_limit_bytes and block_b > 8:
        block_b = _round_up(max(8, block_b // 2), 8)

    B_pad = _round_up(B, block_b)

    # ---- activation-side padding (zero pad; sliced off at the end) ----
    pad_r, pad_c = B_pad - B, d_in_pad - d_in
    x_p = x if (pad_r == 0 and pad_c == 0) else jnp.pad(x, ((0, pad_r), (0, pad_c)))
    cond_p = condition.astype(jnp.int32)
    if pad_r:
        cond_p = jnp.pad(cond_p, (0, pad_r))
    cond2d = cond_p.reshape(B_pad, 1)

    epi_kwargs = dict(eps=float(eps), d_out_true=params.d_out, d_out_pad=d_out_pad,
                      n_cond_pad=n_cond_pad, approx_gelu=bool(approx_gelu))

    if not use_k_tiled:
        kernel = functools.partial(_resident_kernel, **epi_kwargs)
        grid_spec = pltpu.PrefetchScalarGridSpec(
            num_scalar_prefetch=0,
            grid=(B_pad // block_b,),
            in_specs=[
                pl.BlockSpec((block_b, d_in_pad), lambda i: (i, 0)),    # x row tile
                pl.BlockSpec((block_b, 1), lambda i: (i, 0)),           # condition ids
                pl.BlockSpec(memory_space=pltpu.MemorySpace.VMEM),      # W^T (resident, 1x)
                pl.BlockSpec(memory_space=pltpu.MemorySpace.VMEM),      # bias
                pl.BlockSpec(memory_space=pltpu.MemorySpace.VMEM),      # fused gamma|beta
            ],
            out_specs=pl.BlockSpec((block_b, d_out_pad), lambda i: (i, 0)),
        )
        dim_sem = ("parallel",)
    else:
        kernel = functools.partial(_ktiled_kernel, **epi_kwargs)
        grid_spec = pltpu.PrefetchScalarGridSpec(
            num_scalar_prefetch=0,
            grid=(B_pad // block_b, d_in_pad // k_tile),
            in_specs=[
                pl.BlockSpec((block_b, k_tile), lambda i, k: (i, k)),       # x K-slice
                pl.BlockSpec((block_b, 1), lambda i, k: (i, 0)),            # condition ids
                pl.BlockSpec((k_tile, d_out_pad), lambda i, k: (k, 0)),     # W^T K-slice
                pl.BlockSpec(memory_space=pltpu.MemorySpace.VMEM),          # bias
                pl.BlockSpec(memory_space=pltpu.MemorySpace.VMEM),          # fused gamma|beta
            ],
            out_specs=pl.BlockSpec((block_b, d_out_pad), lambda i, k: (i, 0)),
            scratch_shapes=[pltpu.VMEM((block_b, d_out_pad), jnp.float32)],
        )
        dim_sem = ("parallel", "arbitrary")

    out = pl.pallas_call(
        kernel,
        out_shape=jax.ShapeDtypeStruct((B_pad, d_out_pad), out_dtype),
        grid_spec=grid_spec,
        compiler_params=pltpu.CompilerParams(
            dimension_semantics=dim_sem,
            vmem_limit_bytes=vmem_limit_bytes,
        ),
    )(x_p, cond2d, params.wt, params.bias, params.gb)

    return out[:B, :params.d_out]


# --------------------------------------------------------------------------------------
# Reference + tests
# --------------------------------------------------------------------------------------
def _reference(x, condition, W, b, gamma_emb, beta_emb, eps=1e-5):
    if condition.ndim == 2:
        condition = condition[:, 0]
    proj = x @ W.T + b
    mean = proj.mean(-1, keepdims=True)
    var = ((proj - mean) ** 2).mean(-1, keepdims=True)
    x_norm = (proj - mean) / jnp.sqrt(var + eps)
    y = gamma_emb[condition] * x_norm + beta_emb[condition]
    return 0.5 * y * (1.0 + jax.lax.erf(y / jnp.sqrt(2.0)))


if __name__ == "__main__":
    key = jax.random.PRNGKey(0)

    def make_case(k, B, D_in, D_out, n_cond):
        k_x, k_c, k_w, k_b, k_g = jax.random.split(k, 5)
        x = jax.random.normal(k_x, (B, D_in), dtype=jnp.float32)
        condition = jax.random.randint(k_c, (B,), 0, n_cond, dtype=jnp.int32)
        W = jax.random.normal(k_w, (D_out, D_in), dtype=jnp.float32) / jnp.sqrt(D_in)
        b = 0.01 * jax.random.normal(k_b, (D_out,), dtype=jnp.float32)
        gamma_emb = 1.0 + 0.02 * jax.random.normal(k_g, (n_cond, D_out), dtype=jnp.float32)
        beta_emb = 0.01 * jax.random.normal(k_b, (n_cond, D_out), dtype=jnp.float32)
        return x, condition, W, b, gamma_emb, beta_emb

    k1, k2, k3 = jax.random.split(key, 3)

    # Case 1: aligned shapes, resident-W path, multi-step pipelined row grid (2 tiles).
    args1 = make_case(k1, B=64, D_in=128, D_out=256, n_cond=5)
    out1 = jax.block_until_ready(modality_input_block(*args1, block_b=32))
    ref1 = _reference(*args1)
    assert out1.shape == ref1.shape
    assert jnp.allclose(out1, ref1, atol=1e-4, rtol=1e-4), "case 1 mismatch vs reference"

    # Case 2: ragged shapes exercising batch / D_in / D_out padding (resident path).
    args2 = make_case(k2, B=50, D_in=24, D_out=96, n_cond=3)
    out2 = jax.block_until_ready(modality_input_block(*args2, block_b=16))
    ref2 = _reference(*args2)
    assert out2.shape == ref2.shape
    assert jnp.allclose(out2, ref2, atol=1e-4, rtol=1e-4), "case 2 mismatch vs reference"

    # Case 3: forced K-tiled weight-streaming path (3 K-steps of 128) with cached
    #         pre-prepared weight-side params (no per-call transpose/pad).
    args3 = make_case(k3, B=48, D_in=300, D_out=128, n_cond=4)
    x3, c3, W3, b3, g3, be3 = args3
    params3 = prepare_modality_params(W3, b3, g3, be3)
    out3 = jax.block_until_ready(
        modality_input_block(x3, c3, params=params3, force_k_tiled=True, k_tile=128))
    ref3 = _reference(*args3)
    assert out3.shape == ref3.shape
    assert jnp.allclose(out3, ref3, atol=1e-4, rtol=1e-4), "case 3 mismatch vs reference"

    print("KERNEL_OK")
</pallas_src>

<mosaic_0001>
module attributes {stable_mosaic.version = 11 : i64} {
  func.func @_resident_kernel(%arg0: i32, %arg1: memref<32x128xf32, #tpu.memory_space<vmem>>, %arg2: memref<32x1xi32, #tpu.memory_space<vmem>>, %arg3: memref<128x256xf32, #tpu.memory_space<vmem>>, %arg4: memref<1x256xf32, #tpu.memory_space<vmem>>, %arg5: memref<8x512xf32, #tpu.memory_space<vmem>>, %arg6: memref<32x256xf32, #tpu.memory_space<vmem>>) attributes {dimension_semantics = [#tpu.dimension_semantics<parallel>], iteration_bounds = array<i64: 2>, scalar_prefetch = 0 : i64, scratch_operands = 0 : i64, tpu.core_type = #tpu.core_type<tc>, window_params = [{transform_indices = @transform_0, window_bounds = array<i64: 32, 128>}, {transform_indices = @transform_1, window_bounds = array<i64: 32, 1>}, {pipeline_mode = #tpu.pipeline_mode<synchronous>, transform_indices = @transform_2, window_bounds = array<i64: 128, 256>}, {pipeline_mode = #tpu.pipeline_mode<synchronous>, transform_indices = @transform_3, window_bounds = array<i64: 1, 256>}, {pipeline_mode = #tpu.pipeline_mode<synchronous>, transform_indices = @transform_4, window_bounds = array<i64: 8, 512>}, {transform_indices = @transform_5, window_bounds = array<i64: 32, 256>}]} {
    %c0 = arith.constant 0 : index
    %c0_0 = arith.constant 0 : index
    %0 = vector.load %arg1[%c0, %c0_0] : memref<32x128xf32, #tpu.memory_space<vmem>>, vector<32x128xf32>
    %c0_1 = arith.constant 0 : index
    %c0_2 = arith.constant 0 : index
    %1 = vector.load %arg3[%c0_1, %c0_2] : memref<128x256xf32, #tpu.memory_space<vmem>>, vector<128x256xf32>
    %cst = arith.constant dense<0.000000e+00> : vector<32x256xf32>
    %2 = tpu.matmul %0, %1, %cst {dimension_numbers = #tpu.dot_dimension_numbers<[1], [0], [0], [1], [0, 0, 1, 1], [], []>} : vector<32x128xf32>, vector<128x256xf32>, vector<32x256xf32> -> vector<32x256xf32>
    %c0_3 = arith.constant 0 : index
    %c0_4 = arith.constant 0 : index
    %3 = vector.load %arg4[%c0_3, %c0_4] : memref<1x256xf32, #tpu.memory_space<vmem>>, vector<1x256xf32>
    %4 = vector.broadcast %3 : vector<1x256xf32> to vector<32x256xf32>
    %5 = arith.addf %2, %4 : vector<32x256xf32>
    %c0_5 = arith.constant 0 : index
    %c0_6 = arith.constant 0 : index
    %6 = vector.load %arg2[%c0_5, %c0_6] : memref<32x1xi32, #tpu.memory_space<vmem>>, vector<32x1xi32>
    %c0_7 = arith.constant 0 : index
    %c0_8 = arith.constant 0 : index
    %7 = vector.load %arg5[%c0_7, %c0_8] : memref<8x512xf32, #tpu.memory_space<vmem>>, vector<8x512xf32>
    %cst_9 = arith.constant dense<0.000000e+00> : vector<32xf32>
    %8 = vector.multi_reduction <add>, %5, %cst_9 [1] : vector<32x256xf32> to vector<32xf32>
    %9 = vector.shape_cast %8 : vector<32xf32> to vector<32x1xf32>
    %cst_10 = arith.constant 3.906250e-03 : f32
    %10 = vector.broadcast %cst_10 : f32 to vector<32x1xf32>
    %11 = arith.mulf %9, %10 : vector<32x1xf32>
    %12 = vector.broadcast %11 : vector<32x1xf32> to vector<32x256xf32>
    %13 = arith.subf %5, %12 : vector<32x256xf32>
    %14 = arith.mulf %13, %13 : vector<32x256xf32>
    %cst_11 = arith.constant dense<0.000000e+00> : vector<32xf32>
    %15 = vector.multi_reduction <add>, %14, %cst_11 [1] : vector<32x256xf32> to vector<32xf32>
    %16 = vector.shape_cast %15 : vector<32xf32> to vector<32x1xf32>
    %cst_12 = arith.constant 3.906250e-03 : f32
    %17 = vector.broadcast %cst_12 : f32 to vector<32x1xf32>
    %18 = arith.mulf %16, %17 : vector<32x1xf32>
    %cst_13 = arith.constant 9.99999974E-6 : f32
    %19 = vector.broadcast %cst_13 : f32 to vector<32x1xf32>
    %20 = arith.addf %18, %19 : vector<32x1xf32>
    %21 = math.rsqrt %20 : vector<32x1xf32>
    %22 = vector.broadcast %21 : vector<32x1xf32> to vector<32x256xf32>
    %23 = arith.mulf %13, %22 : vector<32x256xf32>
    %24 = tpu.iota {dimensions = array<i32: 1>} : vector<32x8xi32>
    %25 = vector.broadcast %6 : vector<32x1xi32> to vector<32x8xi32>
    %26 = arith.cmpi eq, %25, %24 : vector<32x8xi32>
    %27 = arith.extui %26 : vector<32x8xi1> to vector<32x8xi32>
    %28 = arith.sitofp %27 : vector<32x8xi32> to vector<32x8xf32>
    %cst_14 = arith.constant dense<0.000000e+00> : vector<32x512xf32>
    %29 = tpu.matmul %28, %7, %cst_14 {dimension_numbers = #tpu.dot_dimension_numbers<[1], [0], [0], [1], [0, 0, 1, 1], [], []>} : vector<32x8xf32>, vector<8x512xf32>, vector<32x512xf32> -> vector<32x512xf32>
    %30 = vector.extract_strided_slice %29 {offsets = [0, 0], sizes = [32, 256], strides = [1, 1]} : vector<32x512xf32> to vector<32x256xf32>
    %31 = vector.extract_strided_slice %29 {offsets = [0, 256], sizes = [32, 256], strides = [1, 1]} : vector<32x512xf32> to vector<32x256xf32>
    %32 = arith.mulf %30, %23 : vector<32x256xf32>
    %33 = arith.addf %32, %31 : vector<32x256xf32>
    %cst_15 = arith.constant 5.000000e-01 : f32
    %34 = vector.broadcast %cst_15 : f32 to vector<32x256xf32>
    %35 = arith.mulf %34, %33 : vector<32x256xf32>
    %cst_16 = arith.constant 0.707106769 : f32
    %36 = vector.broadcast %cst_16 : f32 to vector<32x256xf32>
    %37 = arith.mulf %33, %36 : vector<32x256xf32>
    %38 = math.erf %37 : vector<32x256xf32>
    %cst_17 = arith.constant 1.000000e+00 : f32
    %39 = vector.broadcast %cst_17 : f32 to vector<32x256xf32>
    %40 = arith.addf %39, %38 : vector<32x256xf32>
    %41 = arith.mulf %35, %40 : vector<32x256xf32>
    %c0_18 = arith.constant 0 : index
    %c0_19 = arith.constant 0 : index
    %42 = vector.load %arg6[%c0_18, %c0_19] : memref<32x256xf32, #tpu.memory_space<vmem>>, vector<32x256xf32>
    tpu.vector_store %arg6[%c0_18, %c0_19], %41 {strides = array<i32>} : memref<32x256xf32, #tpu.memory_space<vmem>>, vector<32x256xf32>,
    return
  }
  func.func @transform_0(%arg0: i32) -> (i32, i32) {
    %c0_i32 = arith.constant 0 : i32
    %c0_i32_0 = arith.constant 0 : i32
    return %arg0, %c0_i32 : i32, i32
  }
  func.func @transform_1(%arg0: i32) -> (i32, i32) {
    %c0_i32 = arith.constant 0 : i32
    %c0_i32_0 = arith.constant 0 : i32
    return %arg0, %c0_i32 : i32, i32
  }
  func.func @transform_2(%arg0: i32) -> (i32, i32) {
    %c0_i32 = arith.constant 0 : i32
    %c0_i32_0 = arith.constant 0 : i32
    %c0_i32_1 = arith.constant 0 : i32
    return %c0_i32, %c0_i32_0 : i32, i32
  }
  func.func @transform_3(%arg0: i32) -> (i32, i32) {
    %c0_i32 = arith.constant 0 : i32
    %c0_i32_0 = arith.constant 0 : i32
    %c0_i32_1 = arith.constant 0 : i32
    return %c0_i32, %c0_i32_0 : i32, i32
  }
  func.func @transform_4(%arg0: i32) -> (i32, i32) {
    %c0_i32 = arith.constant 0 : i32
    %c0_i32_0 = arith.constant 0 : i32
    %c0_i32_1 = arith.constant 0 : i32
    return %c0_i32, %c0_i32_0 : i32, i32
  }
  func.func @transform_5(%arg0: i32) -> (i32, i32) {
    %c0_i32 = arith.constant 0 : i32
    %c0_i32_0 = arith.constant 0 : i32
    return %arg0, %c0_i32 : i32, i32
  }
}

</mosaic_0001>

<bundles_post_ra>
// kernel: tpu_custom_call.1
= control target key start
LH: loop header
LB: loop body
LE: loop exit
PB: predicated region body
PF: predicated region fallthrough
CT: control target
= control target key end

     0   :  { %10 = vsyncpa [#allocation3], 0  ;;  %s1367_s0 = inlined_call_operand.vmem [shape: f32[64,128], index: 0, kind: input, shape index: {}]   ;;  %s1368_s1 = inlined_call_operand.vmem [shape: s32[64,1], index: 1, kind: input, shape index: {}]   ;;  %s1369_s2 = inlined_call_operand.hbm [shape: f32[128,256], index: 2, kind: input, shape index: {}]   ;;  %s1370_s3 = inlined_call_operand.vmem [shape: f32[1,256], index: 3, kind: input, shape index: {}]   ;;  %s1371_s4 = inlined_call_operand.hbm [shape: f32[8,512], index: 4, kind: input, shape index: {}]   ;;  %s1372_s5 = inlined_call_operand.hbm [shape: f32[64,256], index: 5, kind: output, shape index: {}]  }
   0x1   :  { %11 = vsyncpa [#allocation6], 0 }
   0x2   :  { %12 = vsyncpa [#allocation4], 0 }
   0x3   :  { %14 = vsyncpa [#allocation4 + $0x1], 0  ;;  %s1163_s18 = smov 0   ;;  %s1165_s19 = smov 0  }
   0x4   :  { %s1167_s20 = smov 0   ;;  %s1169_s21 = smov 0  }
   0x5 LB: > { %s1184_s22 = sadd.s32 4294967295, %s1122_s21   ;;  %s877_s23 = sadd.s32 4294967294, %s1122_s21   ;;  %s1122_s21 = sphi %s1169_s21, %s1386_s21   ;;  %s1118_s20 = sphi %s1167_s20, %s1385_s20   ;;  %s1114_s19 = sphi %s1165_s19, %s1384_s19   ;;  %s1110_s18 = sphi %s1163_s18, %s1383_s18  }
   0x6   : > { %s1188_s24 = sadd.s32 1, %s1122_s21   ;;  %s142_s25 = sadd.s32 1, %s1118_s20 }
   0x7   : > { %s139_s26 = ssub.s32 %s1122_s21, %s1188_s24  ;;  %p152_p0 = scmp.ne.s32.totalorder %s1118_s20, %s1114_s19 }
   0x8   : > { %p140_p1 = scmp.eq.s32.totalorder %s139_s26, 0  ;;  %p153_p2 = scmp.eq.s32.totalorder %s1184_s22, 1 }
   0x9   : > { %p158_p3 = scmp.ne.s32.totalorder %s1114_s19, %s1110_s18  ;;  %p159_p4 = scmp.eq.s32.totalorder %s877_s23, 1 }
   0xa   : > { %s1199_s27 = scalar_select %p140_p1, %s1118_s20, %s142_s25  }
   0xb   : > { %p1201_p5 = por %p153_p2, %p152_p0  ;;  %p1205_p6 = por %p159_p4, %p158_p3 }
   0xc   : > { %p878_p7 = scmp.ge.s32.totalorder %s1122_s21, 1  ;;  %p166_p8 = scmp.lt.s32.totalorder %s1122_s21, 3 }
   0xd   : > { %s1375_s29 = scalar_select %p1205_p6, 1, 0 }
   0xe   : > { %p1373_p9 = scmp.eq.s32.totalorder %s1184_s22, 0  ;;  %p1212_p10 = pnand %p878_p7, %p166_p8 }
   0xf   : > { %s1124_s6 = smov [#allocation2]   ;;  %s1125_s9 = smov [#allocation5]  }
  0x10   : > { %s178_s7 = sshll.u32 %s1124_s6, 4  ;;  %p920_p11 = pneg %p1212_p10  ;;  %s179_s7 = int_to_ptr.vmem [resolvable:$true] %s178_s7 }
  0x11   : > { %s195_s10 = sshll.u32 %s1125_s9, 4  ;;  %s1013_s11 = scalar_lea.vmem %s179_s7, 4096  ;;  %s196_s10 = int_to_ptr.vmem [resolvable:$true] %s195_s10 }
  0x12   : > { %p1220_p12 = pnand %p1373_p9, %p920_p11  ;;  %p1014_p0 = scmp.ne.s32.totalorder %s179_s7, %s1013_s11 }
  0x13   : > { %p1021_p3 = scmp.lt.s32.totalorder %s179_s7, %s179_s7  ;;  %p1022_p4 = scmp.lt.s32.totalorder %s1013_s11, %s1013_s11 }
  0x14   : > { %p1004_p13 = pneg %p1220_p12 }
  0x15   : > { %p1023_p7 = por %p1022_p4, %p1021_p3 }
  0x16   : > { %p1016_p1 = pnand %p1014_p0, %p1004_p13 }
  0x18   : > { %p1017_p2 = pneg %p1016_p1 }
  0x1a   : > { %p1024_p8 = pnand %p1023_p7, %p1017_p2 }
  0x1c   : > { %1027 = shalt.err (!%p1024_p8)
}
  0x1d   : > { %s1126_s12 = smov 256   ;;  %s1127_s13 = smov 16  }
  0x1e   : > { %923 = dma.hbm_to_vmem [thread:$0]  (!%p1220_p12), %s1369_s2, 4096, %s179_s7, [#allocation3], %s1126_s12, %s1126_s12, %s1127_s13  }
  0x1f   : > { %s1039_s16 = scalar_lea.vmem %s196_s10, 512  ;;  %p1047_p9 = scmp.lt.s32.totalorder %s196_s10, %s196_s10 }
  0x20   : > { %p1040_p11 = scmp.ne.s32.totalorder %s196_s10, %s1039_s16  ;;  %p1048_p6 = scmp.lt.s32.totalorder %s1039_s16, %s1039_s16 }
  0x22   : > { %p1042_p0 = pnand %p1040_p11, %p1004_p13  ;;  %p1049_p3 = por %p1048_p6, %p1047_p9 }
  0x24   : > { %p1043_p1 = pneg %p1042_p0 }
  0x26   : > { %p1050_p2 = pnand %p1049_p3, %p1043_p1 }
  0x28   : > { %1053 = shalt.err (!%p1050_p2)
}
  0x29   : > { %926 = dma.hbm_to_vmem [thread:$0]  (!%p1220_p12), %s1371_s4, 512, %s196_s10, [#allocation6]  }
  0x2a   : > { %226 = sbr.rel (%p1212_p10) target bundleno = 640 (0x280), region = 40  ;;  %p1378_p4 = scmp.eq.s32.totalorder (!%p1212_p10), %s1184_s22, 0 }
  0x2f   : > { %1097 = dma.done.wait (%p1378_p4), [#allocation3], 4096   ;;  %p1379_p13 = pmov %p1378_p4 }
  0x30   : > { %p1380_p7 = pmov %p1378_p4 }
  0x31   : > { %1099 = vsyncadd (%p1379_p13), [#allocation3], 4294963200 }
  0x32   : > { %1101 = dma.done.wait (%p1380_p7), [#allocation6], 512   ;;  %p1381_p6 = pmov %p1378_p4 }
  0x33   : > { %v1128_v0 = vmov 0.0   ;;  %v1129_v1 = vmov 0   ;;  %s886_s25 = sshll.u32 %s1184_s22, 2  ;;  %v311_v2 = vld [vmem:[#allocation2 + $0xf8] sm:$0xff]  ;;  %v310_v3 = vld [vmem:[#allocation2 + $0xf0] sm:$0xff]  ;;  %v309_v4 = vld [vmem:[#allocation2 + $0xe8] sm:$0xff]  ;;  %v314_v45 = vlaneseq }
  0x34   : > { %1103 = vsyncadd (%p1381_p6), [#allocation6], 4294966784  ;;  %388 = vmatprep.mubr.f32.mxu0 %v1128_v0  ;;  %976 = vset.pattern.permute.xlu0 %v1129_v1  ;;  %p264_p9 = scmp.lt.s32.totalorder %s886_s25, 7  ;;  %v308_v5 = vld [vmem:[#allocation2 + $0xe0] sm:$0xff]  ;;  %v307_v6 = vld [vmem:[#allocation2 + $0xd8] sm:$0xff]  ;;  %vm511_vm0 = vcmask 64512  }
  0x35   : > { %977 = vset.pattern.permute.xlu1 %v1129_v1  ;;  %588 = vmatprep.mubr.f32.mxu1 %v1128_v0  ;;  %v306_v7 = vld [vmem:[#allocation2 + $0xd0] sm:$0xff]  ;;  %v305_v8 = vld [vmem:[#allocation2 + $0xc8] sm:$0xff]  ;;  %v304_v9 = vld [vmem:[#allocation2 + $0xc0] sm:$0xff]  ;;  %v486_v46 = vand.u32 127, %v314_v45  ;;  %v315_v56 = vshrl.u32 %v314_v45, 7  ;;  %s260_s13 = sand.u32 1, %s1114_s19  }
  0x36   : > { %324 = vmatprep.subr.mxu0 %v311_v2  ;;  %s1388_s25 = smov (!%p264_p9, %s886_s25), 7  ;;  %v303_v10 = vld [vmem:[#allocation2 + $0xb8] sm:$0xff]  ;;  %v302_v11 = vld [vmem:[#allocation2 + $0xb0] sm:$0xff]  ;;  %v301_v12 = vld [vmem:[#allocation2 + $0xa8] sm:$0xff]  ;;  %s885_s14 = sshll.u32 %s260_s13, 6 }
  0x37   : > { %325 = vmatpush1.msra.mxu0 %v310_v3  ;;  %s887_s26 = sshll.u32 %s1388_s25, 3  ;;  %v300_v13 = vld [vmem:[#allocation2 + $0xa0] sm:$0xff]  ;;  %v299_v14 = vld [vmem:[#allocation2 + $0x98] sm:$0xff]  ;;  %v298_v15 = vld [vmem:[#allocation2 + $0x90] sm:$0xff]  ;;  %v316_v57 = vsub.s32 0, %v315_v56  ;;  %v320_v58 = vsub.s32 1, %v315_v56 }
  0x38   : > { %326 = vmatprep.subr.mxu0 %v309_v4  ;;  %s273_s7 = scalar_lea.vmem %s1368_s1, %s887_s26  ;;  %v297_v16 = vld [vmem:[#allocation2 + $0x88] sm:$0xff]  ;;  %v296_v19 = vld [vmem:[#allocation2 + $0x80] sm:$0xff]  ;;  %v295_v20 = vld [vmem:[#allocation2 + $0x78] sm:$0xff]  ;;  %s267_s10 = scalar_lea.vmem %s1367_s0, %s887_s26 }
  0x39   : > { %327 = vmatpush1.msra.mxu0 %v308_v5  ;;  %v413_v17 = vld [vmem:[%s273_s7] sm:$0xff]  ;;  %v415_v18 = vld [vmem:[%s273_s7 + $0x10] sm:$0xff]  ;;  %v414_v21 = vld [vmem:[%s273_s7 + $0x8] sm:$0xff]  ;;  %s1306_s15 = scalar_lea.vmem [#allocation7], %s885_s14  ;;  %s909_s16 = sshll.u32 %s1184_s22, 10 }
  0x3a   : > { %328 = vmatprep.subr.mxu0 %v307_v6  ;;  %488 = vperm.xlu0 %976, %v413_v17   ;;  %v294_v22 = vld [vmem:[#allocation2 + $0x70] sm:$0xff]  ;;  %v416_v23 = vld [vmem:[%s273_s7 + $0x18] sm:$0xff]  ;;  %v293_v24 = vld [vmem:[#allocation2 + $0x68] sm:$0xff]  ;;  %s781_s17 = sshll.u32 %s1306_s15, 4  ;;  %s1319_s26 = scalar_lea.hbm %s1372_s5, %s909_s16  ;;  %s1321_s17 = int_to_ptr.vmem [resolvable:$true] %s781_s17 }
  0x3b   : > { %329 = vmatpush1.msra.mxu0 %v306_v7  ;;  %494 = vperm.xlu1 %977, %v415_v18   ;;  %v292_v25 = vld [vmem:[#allocation2 + $0x60] sm:$0xff]  ;;  %v291_v26 = vld [vmem:[#allocation2 + $0x58] sm:$0xff]  ;;  %v290_v27 = vld [vmem:[#allocation2 + $0x50] sm:$0xff]  ;;  %s1327_s22 = scalar_lea.sflag [#allocation4], %s260_s13  ;;  %s1054_s30 = scalar_lea.vmem %s1321_s17, 1024 }
  0x3c   : > { %330 = vmatprep.subr.mxu0 %v305_v8  ;;  %v289_v28 = vld [vmem:[#allocation2 + $0x48] sm:$0xff]  ;;  %v288_v29 = vld [vmem:[#allocation2 + $0x40] sm:$0xff]  ;;  %v287_v30 = vld [vmem:[#allocation2 + $0x38] sm:$0xff]  ;;  %p1055_p10 = scmp.ne.s32.totalorder %s1321_s17, %s1054_s30  ;;  %s1130_s6 = smov [#allocation7]  }
  0x3d   : > { %331 = vmatpush1.msra.mxu0 %v304_v9  ;;  %v286_v31 = vld [vmem:[#allocation2 + $0x30] sm:$0xff]  ;;  %v285_v32 = vld [vmem:[#allocation2 + $0x28] sm:$0xff]  ;;  %v284_v33 = vld [vmem:[#allocation2 + $0x20] sm:$0xff]  ;;  %s1058_s7 = sshll.u32 %s1130_s6, 4  ;;  %s1059_s7 = int_to_ptr.vmem [resolvable:$false] %s1058_s7 }
  0x3e   : > { %332 = vmatprep.subr.mxu0 %v303_v10  ;;  %491 = vperm.xlu0 %976, %v414_v21   ;;  %v283_v34 = vld [vmem:[#allocation2 + $0x18] sm:$0xff]  ;;  %v282_v35 = vld [vmem:[#allocation2 + $0x10] sm:$0xff]  ;;  %v281_v36 = vld [vmem:[#allocation2 + $0x8] sm:$0xff]  ;;  %p1056_p12 = pnand %p1055_p10, %p1201_p5  ;;  %s1060_s8 = scalar_lea.vmem %s1059_s7, 2048 }
  0x3f   : > { %333 = vmatpush1.msra.mxu0 %v302_v11  ;;  %497 = vperm.xlu1 %977, %v416_v23   ;;  %v280_v37 = vld [vmem:[#allocation2] sm:$0xff]  ;;  %v277_v39 = vld [vmem:[%s267_s10 + $0x8] sm:$0xff]  ;;  %v278_v40 = vld [vmem:[%s267_s10 + $0x10] sm:$0xff]  ;;  %p1061_p11 = scmp.lt.s32.totalorder %s1321_s17, %s1059_s7  ;;  %p1062_p0 = scmp.lt.s32.totalorder %s1060_s8, %s1054_s30 }
  0x40   : > { %334 = vmatprep.subr.mxu0 %v301_v12  ;;  %v276_v38 = vld [vmem:[%s267_s10] sm:$0xff]  ;;  %v279_v41 = vld [vmem:[%s267_s10 + $0x18] sm:$0xff]  ;;  %v418_v42 = vld [vmem:[#allocation5 + $0x8] sm:$0xff]  ;;  %p1057_p8 = pneg %p1056_p12 }
  0x41   : > { %335 = vmatpush1.msra.mxu0 %v300_v13  ;;  %v417_v43 = vld [vmem:[#allocation5] sm:$0xff]  ;;  %v420_v44 = vld [vmem:[#allocation5 + $0x18] sm:$0xff]  ;;  %554 = vmatprep.subr.mxu1 %v418_v42  ;;  %v419_v49 = vld [vmem:[#allocation5 + $0x10] sm:$0xff]  ;;  %p1063_p1 = por %p1062_p0, %p1061_p11 }
  0x42   : > { %336 = vmatprep.subr.mxu0 %v299_v14  ;;  %555 = vmatpush1.msra.mxu1 %v417_v43  ;;  %v312_v59 = vld [vmem:[%s1370_s3] sm:$0x3] }
  0x43   : > { %337 = vmatpush1.msra.mxu0 %v298_v15  ;;  %643 = vmatprep.subr.mxu1 %v420_v44  ;;  %v317_v60 = vrot.slane %v312_v59, %v316_v57  ;;  %v321_v61 = vrot.slane %v312_v59, %v320_v58  ;;  %p1064_p3 = pnand %p1063_p1, %p1057_p8 }
  0x44   : > { %338 = vmatprep.subr.mxu0 %v297_v16 }
  0x45   : > { %339 = vmatpush1.msra.mxu0 %v296_v19 }
  0x46   : > { %340 = vmatprep.subr.mxu0 %v295_v20 }
  0x47   : > { %341 = vmatpush1.msra.mxu0 %v294_v22 }
  0x48   : > { %342 = vmatprep.subr.mxu0 %v293_v24 }
  0x49   : > { %343 = vmatpush1.msra.mxu0 %v292_v25 }
  0x4a   : > { %344 = vmatprep.subr.mxu0 %v291_v26 }
  0x4b   : > { %345 = vmatpush1.msra.mxu0 %v290_v27 }
  0x4c   : > { %346 = vmatprep.subr.mxu0 %v289_v28 }
  0x4d   : > { %347 = vmatpush1.msra.mxu0 %v288_v29 }
  0x4e   : > { %348 = vmatprep.subr.mxu0 %v287_v30 }
  0x4f   : > { %349 = vmatpush1.msra.mxu0 %v286_v31 }
  0x50   : > { %350 = vmatprep.subr.mxu0 %v285_v32 }
  0x51   : > { %351 = vmatpush1.msra.mxu0 %v284_v33 }
  0x52   : > { %352 = vmatprep.subr.mxu0 %v283_v34 }
  0x53   : > { %353 = vmatpush1.msra.mxu0 %v282_v35 }
  0x54   : > { %354 = vmatprep.subr.mxu0 %v281_v36 }
  0x55   : > { %355 = vmatpush1.msra.mxu0 %v280_v37 }
  0x56   : > { %389 = vmatmul.mubr.f32.vlgmr.msra.gmra.mxu0 %v276_v38 }
  0x57   : > { %394 = vmatprep.mubr.f32.mxu0 %v1128_v0 }
  0x5a   : > { %395 = vmatmul.mubr.f32.gmra.mxu0 %v277_v39 }
  0x5b   : > { %400 = vmatprep.mubr.f32.mxu0 %v1128_v0 }
  0x5e   : > { %401 = vmatmul.mubr.f32.gmra.mxu0 %v278_v40 }
  0x5f   : > { %406 = vmatprep.mubr.f32.mxu0 %v1128_v0 }
  0x62   : > { %407 = vmatmul.mubr.f32.gmra.mxu0 %v279_v41 }
  0xb5   : > { %v489_v47 = vpop.permute.xlu0 %488 }
  0xb6   : > { %vm499_vm1 = vcmp.eq.s32.totalorder %v489_v47, %v486_v46  ;;  %v495_v48 = vpop.permute.xlu1 %494 }
  0xb7   : > { %v890_v50 = vsel %vm499_vm1, 1.0, %v1128_v0  ;;  %vm501_vm3 = vcmp.eq.s32.totalorder %v495_v48, %v486_v46 }
  0xb8   : > { %894 = vmatmul.mubr.msk.f32.vlgmr.msra.gmra.mxu1 %vm511_vm0, %v890_v50  ;;  %v892_v54 = vsel %vm501_vm3, 1.0, %v1128_v0 }
  0xb9   : > { %v492_v51 = vpop.permute.xlu0 %491  ;;  %594 = vmatprep.mubr.f32.mxu1 %v1128_v0  ;;  %644 = vmatpush1.msra.mxu1 %v419_v49 }
  0xba   : > { %vm500_vm2 = vcmp.eq.s32.totalorder %v492_v51, %v486_v46  ;;  %v498_v53 = vpop.permute.xlu1 %497 }
  0xbb   : > { %v891_v52 = vsel %vm500_vm2, 1.0, %v1128_v0  ;;  %vm502_vm4 = vcmp.eq.s32.totalorder %v498_v53, %v486_v46 }
  0xbc   : > { %895 = vmatmul.mubr.msk.f32.gmra.mxu1 %vm511_vm0, %v891_v52  ;;  %v893_v55 = vsel %vm502_vm4, 1.0, %v1128_v0 }
  0xbd   : > { %600 = vmatprep.mubr.f32.mxu1 %v1128_v0 }
  0xc0   : > { %896 = vmatmul.mubr.msk.f32.gmra.mxu1 %vm511_vm0, %v892_v54 }
  0xc1   : > { %606 = vmatprep.mubr.f32.mxu1 %v1128_v0 }
  0xc4   : > { %897 = vmatmul.mubr.msk.f32.gmra.mxu1 %vm511_vm0, %v893_v55 }
  0xc5   : > { %677 = vmatprep.mubr.f32.mxu1 %v1128_v0 }
  0xc8   : > { %898 = vmatmul.mubr.msk.f32.vlgmr.msra.gmra.mxu1 %vm511_vm0, %v890_v50 }
  0xc9   : > { %683 = vmatprep.mubr.f32.mxu1 %v1128_v0 }
  0xcc   : > { %899 = vmatmul.mubr.msk.f32.gmra.mxu1 %vm511_vm0, %v891_v52 }
  0xcd   : > { %689 = vmatprep.mubr.f32.mxu1 %v1128_v0 }
  0xd0   : > { %900 = vmatmul.mubr.msk.f32.gmra.mxu1 %vm511_vm0, %v892_v54 }
  0xd1   : > { %695 = vmatprep.mubr.f32.mxu1 %v1128_v0 }
  0xd4   : > { %901 = vmatmul.mubr.msk.f32.gmra.mxu1 %vm511_vm0, %v893_v55 }
 0x116   : > { %v390_v62 = vpop.f32.mrf.mxu0 }
 0x117   : > { %v391_v1 = vadd.f32 %v390_v62, %v317_v60 }
 0x118   : > { %v392_v63 = vpop.f32.mrf.mxu0 }
 0x119   : > { %v393_v2 = vadd.f32 %v392_v63, %v321_v61 }
 0x11a   : > { %v396_v3 = vpop.f32.mrf.mxu0 }
 0x11b   : > { %v421_v4 = vadd.f32 %v393_v2, %v391_v1  ;;  %v397_v6 = vadd.f32 %v396_v3, %v317_v60 }
 0x11c   : > { %v398_v5 = vpop.f32.mrf.mxu0 }
 0x11d   : > { %v399_v0 = vadd.f32 %v398_v5, %v321_v61  ;;  %422 = vadd.xlane.f32.xlu0 %v421_v4 }
 0x11e   : > { %v402_v7 = vpop.f32.mrf.mxu0 }
 0x11f   : > { %v424_v8 = vadd.f32 %v399_v0, %v397_v6  ;;  %v403_v10 = vadd.f32 %v402_v7, %v317_v60 }
 0x120   : > { %v404_v9 = vpop.f32.mrf.mxu0 }
 0x121   : > { %v405_v11 = vadd.f32 %v404_v9, %v321_v61  ;;  %425 = vadd.xlane.f32.xlu1 %v424_v8 }
 0x122   : > { %v408_v12 = vpop.f32.mrf.mxu0 }
 0x123   : > { %v427_v13 = vadd.f32 %v405_v11, %v403_v10  ;;  %v409_v15 = vadd.f32 %v408_v12, %v317_v60 }
 0x124   : > { %v410_v14 = vpop.f32.mrf.mxu0 }
 0x125   : > { %v411_v16 = vadd.f32 %v410_v14, %v321_v61  ;;  %428 = vadd.xlane.f32.xlu0 %v427_v13 }
 0x127   : > { %v430_v17 = vadd.f32 %v411_v16, %v409_v15 }
 0x129   : > { %431 = vadd.xlane.f32.xlu0 %v430_v17 }
 0x178   : > { %v590_v46 = vpop.f32.mrf.mxu1 }
 0x17a   : > { %v592_v47 = vpop.f32.mrf.mxu1 }
 0x17c   : > { %v596_v48 = vpop.f32.mrf.mxu1 }
 0x17e   : > { %v598_v49 = vpop.f32.mrf.mxu1 }
 0x180   : > { %v602_v50 = vpop.f32.mrf.mxu1 }
 0x182   : > { %v604_v51 = vpop.f32.mrf.mxu1 }
 0x184   : > { %v608_v52 = vpop.f32.mrf.mxu1 }
 0x186   : > { %v610_v55 = vpop.f32.mrf.mxu1 }
 0x188   : > { %v679_v59 = vpop.f32.mrf.mxu1 }
 0x18a   : > { %v681_v63 = vpop.f32.mrf.mxu1 }
 0x18c   : > { %v685_v4 = vpop.f32.mrf.mxu1 }
 0x1a6   : > { %v423_v18 = vpop.xlane.xlu0 %422 }
 0x1a7   : > { %v433_v19 = vmul.f32 0.00390625, %v423_v18 }
 0x1a9   : > { %v437_v20 = vsub.f32 %v391_v1, %v433_v19  ;;  %v438_v21 = vsub.f32 %v393_v2, %v433_v19 }
 0x1aa   : > { %v426_v22 = vpop.xlane.xlu1 %425 }
 0x1ab   : > { %v434_v23 = vmul.f32 0.00390625, %v426_v22  ;;  %v445_v24 = vmul.f32 %v437_v20, %v437_v20  ;;  %v446_v25 = vmul.f32 %v438_v21, %v438_v21 }
 0x1ad   : > { %v439_v26 = vsub.f32 %v397_v6, %v434_v23  ;;  %v440_v27 = vsub.f32 %v399_v0, %v434_v23  ;;  %v453_v28 = vadd.f32 %v446_v25, %v445_v24  ;;  %v687_v0 = vpop.f32.mrf.mxu1 }
 0x1ae   : > { %v429_v29 = vpop.xlane.xlu0 %428 }
 0x1af   : > { %v435_v30 = vmul.f32 0.00390625, %v429_v29  ;;  %454 = vadd.xlane.f32.xlu1 %v453_v28  ;;  %v447_v31 = vmul.f32 %v439_v26, %v439_v26  ;;  %v448_v32 = vmul.f32 %v440_v27, %v440_v27  ;;  %v691_v12 = vpop.f32.mrf.mxu1 }
 0x1b1   : > { %v441_v33 = vsub.f32 %v403_v10, %v435_v30  ;;  %v442_v34 = vsub.f32 %v405_v11, %v435_v30  ;;  %v456_v35 = vadd.f32 %v448_v32, %v447_v31  ;;  %v693_v24 = vpop.f32.mrf.mxu1 }
 0x1b2   : > { %v432_v36 = vpop.xlane.xlu0 %431 }
 0x1b3   : > { %v436_v37 = vmul.f32 0.00390625, %v432_v36  ;;  %457 = vadd.xlane.f32.xlu0 %v456_v35  ;;  %v449_v38 = vmul.f32 %v441_v33, %v441_v33  ;;  %v450_v39 = vmul.f32 %v442_v34, %v442_v34 }
 0x1b5   : > { %v1293_v40 = vsub.f32 %v409_v15, %v436_v37  ;;  %v1295_v41 = vsub.f32 %v411_v16, %v436_v37  ;;  %v459_v42 = vadd.f32 %v450_v39, %v449_v38 }
 0x1b7   : > { %460 = vadd.xlane.f32.xlu1 %v459_v42  ;;  %v451_v43 = vmul.f32 %v1293_v40, %v1293_v40  ;;  %v452_v44 = vmul.f32 %v1295_v41, %v1295_v41 }
 0x1b9   : > { %v462_v45 = vadd.f32 %v452_v44, %v451_v43 }
 0x1bb   : > { %463 = vadd.xlane.f32.xlu0 %v462_v45 }
 0x238   : > { %v455_v53 = vpop.xlane.xlu1 %454 }
 0x239   : > { %v465_v54 = vmul.f32 0.00390625, %v455_v53 }
 0x23b   : > { %v469_v56 = vadd.f32 1e-05, %v465_v54 }
 0x23c   : > { %v458_v57 = vpop.xlane.xlu0 %457 }
 0x23d   : > { %978 = vrsqrt.f32 %v469_v56  ;;  %v466_v58 = vmul.f32 0.00390625, %v458_v57 }
 0x23f   : > { %v470_v60 = vadd.f32 1e-05, %v466_v58 }
 0x240   : > { %v461_v61 = vpop.xlane.xlu1 %460 }
 0x241   : > { %980 = vrsqrt.f32 %v470_v60  ;;  %v467_v62 = vmul.f32 0.00390625, %v461_v61 }
 0x243   : > { %v471_v1 = vadd.f32 1e-05, %v467_v62 }
 0x244   : > { %v464_v2 = vpop.xlane.xlu0 %463 }
 0x245   : > { %982 = vrsqrt.f32 %v471_v1  ;;  %v468_v3 = vmul.f32 0.00390625, %v464_v2 }
 0x247   : > { %v472_v5 = vadd.f32 1e-05, %v468_v3 }
 0x249   : > { %984 = vrsqrt.f32 %v472_v5 }
 0x24a   : > { %v979_v6 = vpop.eup %978 }
 0x24b   : > { %v477_v7 = vmul.f32 %v979_v6, %v437_v20  ;;  %v478_v8 = vmul.f32 %v979_v6, %v438_v21 }
 0x24d   : > { %v702_v9 = vmul.f32 %v590_v46, %v477_v7  ;;  %v703_v10 = vmul.f32 %v592_v47, %v478_v8 }
 0x24e   : > { %v981_v11 = vpop.eup %980 }
 0x24f   : > { %v710_v13 = vadd.f32 %v702_v9, %v679_v59  ;;  %v711_v14 = vadd.f32 %v703_v10, %v681_v63  ;;  %v479_v15 = vmul.f32 %v981_v11, %v439_v26  ;;  %v480_v16 = vmul.f32 %v981_v11, %v440_v27  ;;  %v697_v26 = vpop.f32.mrf.mxu1 }
 0x251   : > { %v726_v17 = vmul.f32 0.70710677, %v710_v13  ;;  %v727_v18 = vmul.f32 0.70710677, %v711_v14  ;;  %v704_v22 = vmul.f32 %v596_v48, %v479_v15  ;;  %v705_v23 = vmul.f32 %v598_v49, %v480_v16  ;;  %v699_v43 = vpop.f32.mrf.mxu1 }
 0x252   : > { %v983_v19 = vpop.eup %982 }
 0x253   : > { %986 = verf.f32 %v726_v17  ;;  %v481_v25 = vmul.f32 %v983_v19, %v441_v33  ;;  %v482_v28 = vmul.f32 %v983_v19, %v442_v34  ;;  %v712_v20 = vadd.f32 %v704_v22, %v685_v4 }
 0x254   : > { %988 = verf.f32 %v727_v18  ;;  %v713_v21 = vadd.f32 %v705_v23, %v687_v0 }
 0x255   : > { %v706_v29 = vmul.f32 %v602_v50, %v481_v25  ;;  %v707_v30 = vmul.f32 %v604_v51, %v482_v28  ;;  %v728_v32 = vmul.f32 0.70710677, %v712_v20  ;;  %v719_v50 = vmul.f32 0.5, %v711_v14 }
 0x256   : > { %v985_v31 = vpop.eup %984  ;;  %v729_v35 = vmul.f32 0.70710677, %v713_v21  ;;  %v720_v56 = vmul.f32 0.5, %v712_v20  ;;  %v721_v58 = vmul.f32 0.5, %v713_v21 }
 0x257   : > { %v714_v27 = vadd.f32 %v706_v29, %v691_v12  ;;  %v715_v36 = vadd.f32 %v707_v30, %v693_v24  ;;  %v483_v37 = vmul.f32 %v985_v31, %v1293_v40  ;;  %v484_v38 = vmul.f32 %v985_v31, %v1295_v41 }
 0x258   : > { %990 = verf.f32 %v728_v32  ;;  %v718_v41 = vmul.f32 0.5, %v710_v13 }
 0x259   : > { %992 = verf.f32 %v729_v35  ;;  %v730_v33 = vmul.f32 0.70710677, %v714_v27  ;;  %v731_v34 = vmul.f32 0.70710677, %v715_v36  ;;  %v708_v39 = vmul.f32 %v608_v52, %v483_v37 }
 0x25a   : > { %v709_v42 = vmul.f32 %v610_v55, %v484_v38  ;;  %v722_v1 = vmul.f32 0.5, %v714_v27  ;;  %v723_v3 = vmul.f32 0.5, %v715_v36 }
 0x25b   : > { %994 = verf.f32 %v730_v33  ;;  %v716_v44 = vadd.f32 %v708_v39, %v697_v26 }
 0x25c   : > { %996 = verf.f32 %v731_v34  ;;  %v717_v45 = vadd.f32 %v709_v42, %v699_v43 }
 0x25d   : > { %v732_v46 = vmul.f32 0.70710677, %v716_v44  ;;  %v724_v8 = vmul.f32 0.5, %v716_v44 }
 0x25e   : > { %v733_v47 = vmul.f32 0.70710677, %v717_v45  ;;  %v725_v10 = vmul.f32 0.5, %v717_v45 }
 0x25f   : > { %998 = verf.f32 %v732_v46 }
 0x260   : > { %v987_v40 = vpop.eup %986  ;;  %1000 = verf.f32 %v733_v47 }
 0x261   : > { %v989_v48 = vpop.eup %988  ;;  %v742_v49 = vadd.f32 1.0, %v987_v40 }
 0x262   : > { %v743_v51 = vadd.f32 1.0, %v989_v48 }
 0x263   : > { %v750_v52 = vmul.f32 %v742_v49, %v718_v41 }
 0x264   : > { %v751_v53 = vmul.f32 %v743_v51, %v719_v50 }
 0x265   : > { %v991_v54 = vpop.eup %990  ;;  %758 = vst [vmem:[%s1306_s15] sm:$0xff] %v750_v52 }
 0x266   : > { %v993_v55 = vpop.eup %992  ;;  %759 = vst [vmem:[%s1306_s15 + $0x8] sm:$0xff] %v751_v53  ;;  %v744_v57 = vadd.f32 1.0, %v991_v54 }
 0x267   : > { %v745_v59 = vadd.f32 1.0, %v993_v55 }
 0x268   : > { %v995_v60 = vpop.eup %994  ;;  %v752_v61 = vmul.f32 %v744_v57, %v720_v56 }
 0x269   : > { %v997_v62 = vpop.eup %996  ;;  %v753_v63 = vmul.f32 %v745_v59, %v721_v58  ;;  %v746_v2 = vadd.f32 1.0, %v995_v60 }
 0x26a   : > { %760 = vst [vmem:[%s1306_s15 + $0x10] sm:$0xff] %v752_v61  ;;  %v747_v4 = vadd.f32 1.0, %v997_v62 }
 0x26b   : > { %761 = vst [vmem:[%s1306_s15 + $0x18] sm:$0xff] %v753_v63  ;;  %v754_v5 = vmul.f32 %v746_v2, %v722_v1 }
 0x26c   : > { %v755_v6 = vmul.f32 %v747_v4, %v723_v3  ;;  %v999_v0 = vpop.eup %998 }
 0x26d   : > { %762 = vst [vmem:[%s1306_s15 + $0x20] sm:$0xff] %v754_v5  ;;  %v1001_v7 = vpop.eup %1000  ;;  %v748_v9 = vadd.f32 1.0, %v999_v0 }
 0x26e   : > { %763 = vst [vmem:[%s1306_s15 + $0x28] sm:$0xff] %v755_v6  ;;  %v749_v11 = vadd.f32 1.0, %v1001_v7 }
 0x26f   : > { %v756_v12 = vmul.f32 %v748_v9, %v724_v8 }
 0x270   : > { %v757_v13 = vmul.f32 %v749_v11, %v725_v10 }
 0x271   : > { %764 = vst [vmem:[%s1306_s15 + $0x30] sm:$0xff] %v756_v12 }
 0x272   : > { %765 = vst [vmem:[%s1306_s15 + $0x38] sm:$0xff] %v757_v13 }
 0x273   : > { %1067 = shalt.err (!%p1064_p3)
}
 0x274   : > { %s1068_s9 = scalar_lea.hbm %s1319_s26, 1024  ;;  %s1072_s12 = scalar_lea.hbm %s1372_s5, 2048 }
 0x275   : > { %p1069_p2 = scmp.ne.s32.totalorder %s1319_s26, %s1068_s9  ;;  %p1073_p7 = scmp.lt.s32.totalorder %s1319_s26, %s1372_s5 }
 0x276   : > { %p1074_p6 = scmp.lt.s32.totalorder %s1072_s12, %s1068_s9 }
 0x277   : > { %p1070_p4 = pnand %p1069_p2, %p1201_p5 }
 0x278   : > { %p1075_p9 = por %p1074_p6, %p1073_p7 }
 0x279   : > { %p1071_p13 = pneg %p1070_p4 }
 0x27b   : > { %p1076_p10 = pnand %p1075_p9, %p1071_p13 }
 0x27d   : > { %1079 = shalt.err (!%p1076_p10)
}
 0x27e   : > { %s1131_s15 = smov 256   ;;  %s1132_s16 = smov 16  }
 0x27f   : > { %918 = dma.vmem_to_hbm [thread:$0]  (%p1201_p5), %s1321_s17, 1024, %s1319_s26, %s1327_s22, %s1131_s15, %s1131_s15, %s1132_s16  }
 0x280 PF: > { %p935_p12 = scmp.ge.s32.totalorder %s1122_s21, 2  ;;  %s796_s23 = sand.u32 1, %s1110_s18  }
 0x281   : > { %p1382_p8 = scmp.ne.s32.totalorder %s1375_s29, 0  ;;  %s797_s25 = scalar_lea.sflag [#allocation4], %s796_s23 }
 0x283   : > { %p928_p11 = pnand %p935_p12, %p1382_p8 }
 0x285   : > { %p929_p0 = pneg %p928_p11 }
 0x287   : > { %1105 = dma.done.wait (%p929_p0), %s797_s25, 1024  }
 0x288   : > { %1107 = vsyncadd (%p929_p0), %s797_s25, 4294966272  ;;  %p17_p1 = scmp.ge.s32.totalorder %s1188_s24, 4   ;;  %s1383_s18 = smov %s1114_s19 }
 0x289   : > { %s1384_s19 = smov %s1118_s20  ;;  %s1385_s20 = smov %s1199_s27 }
 0x28a   : > { %s1386_s21 = smov %s1188_s24  ;;  %19 = sbr.rel (!%p17_p1) target bundleno = 5 (0x5), region = 87 }
 0x28f   :  { %802 = vsyncpa [#allocation3], 1 }
 0x290   :  { %804 = vsyncpa [#allocation3 + $0x1], 1 }
 0x291   :  { %805 = vsyncpa [#allocation6], 1 }
 0x292   :  { %806 = vsyncpa [#allocation4], 1 }
 0x293   :  { %808 = vsyncpa [#allocation4 + $0x1], 1 }

</bundles_post_ra>
